<compile_context>
chip_gen: v7x
topology: tpu7x:2x2x1
jax: 0.10.0
libtpu: 0.0.40
codegen_flags: <defaults>
</compile_context>

<pallas_src>
import jax
import jax.numpy as jnp
import numpy as np
from jax import lax
from jax.experimental import pallas as pl
from jax.experimental.pallas import tpu as pltpu


def _pwce_kernel(cw_ref, w_ref, t_ref, x_ref, o_ref):
    n = pl.program_id(1)                           # inner (reduction) axis

    @pl.when(n == 0)
    def _():
        o_ref[...] = jnp.zeros_like(o_ref)

    x = x_ref[0].astype(jnp.float32)               # (C, TS) logits for batch n
    C, TS = x.shape

    # log-softmax pieces over the class (sublane) axis, all in f32.
    m = jnp.max(x, axis=0, keepdims=True)          # (1, TS)
    lse = jnp.log(jnp.sum(jnp.exp(x - m), axis=0, keepdims=True))  # (1, TS)

    tgt = t_ref[0]                                 # (1, TS) int32 labels
    cls = lax.broadcasted_iota(jnp.int32, (C, TS), 0)
    onehot = cls == tgt                            # (C, TS) bool

    # gather-at-target: -logp[target] = m + lse - x[target]
    picked_x = jnp.sum(jnp.where(onehot, x, 0.0), axis=0, keepdims=True)

    # class-weight * pixel-weight at the target class (pixel weights are
    # class-indexed because of the reference's expand_as broadcast quirk).
    cww = cw_ref[...].astype(jnp.float32) * w_ref[...].astype(jnp.float32)  # (C, TS)
    picked_cww = jnp.sum(jnp.where(onehot, cww, 0.0), axis=0, keepdims=True)

    # lane-wise partial accumulation (no cross-lane reduce on the hot path).
    o_ref[0] = o_ref[0] + picked_cww * (m + lse - picked_x)


def pixel_wise_cross_entropy_loss(logits, target, weights, class_weights=None,
                                  ignore_index=None, tile_s=None):
    """logits: (N, C, D, H, W); target/weights: (N, D, H, W).  Returns scalar."""
    # TODO(synk): ignore_index branch of expand_as_one_hot is not implemented.
    assert ignore_index is None
    N, C, D, H, W = logits.shape
    assert target.shape == (N, D, H, W)
    assert weights.shape == target.shape
    # NOTE: the reference's weights.unsqueeze(0).expand_as(input) only
    # broadcasts when N == C and makes the pixel weights class-indexed.
    assert N == C, "reference semantics require N == C"
    S = D * H * W

    if class_weights is None:
        class_weights = jnp.ones((C,), jnp.float32)

    ix = jnp.dtype(logits.dtype).itemsize
    iw = jnp.dtype(weights.dtype).itemsize
    s_pad128 = pl.cdiv(S, 128) * 128
    if tile_s is None:
        # Largest lane tile whose double-buffered blocks stay well inside the
        # default scoped-VMEM window on every generation (v5e default: 16 MiB).
        per_lane_bytes = 2 * (C * ix + C * iw + 4 + 4)   # logits+weights+target+out
        budget = 12 * 1024 * 1024
        tile_s = (budget // per_lane_bytes) // 128 * 128
        tile_s = max(128, min(8192, tile_s, s_pad128))
    assert tile_s % 128 == 0

    s_pad = pl.cdiv(S, tile_s) * tile_s
    n_s_tiles = s_pad // tile_s

    # Native-dtype DMA (cast to f32 inside the kernel); pad the tail tile with
    # zero pixel-weights so padded lanes contribute exactly 0 to the sum.
    x3 = logits.reshape(N, C, S)
    w2 = weights.reshape(N, S)                     # leading dim acts as class dim
    t3 = target.reshape(N, 1, S).astype(jnp.int32)
    pad = s_pad - S
    if pad:
        x3 = jnp.pad(x3, ((0, 0), (0, 0), (0, pad)))
        w2 = jnp.pad(w2, ((0, 0), (0, pad)))
        t3 = jnp.pad(t3, ((0, 0), (0, 0), (0, pad)))
    cw2 = class_weights.reshape(C, 1).astype(jnp.float32)

    grid = (n_s_tiles, N)                          # spatial OUTER, batch INNER

    partials = pl.pallas_call(
        _pwce_kernel,
        out_shape=jax.ShapeDtypeStruct((n_s_tiles, 1, tile_s), jnp.float32),
        grid_spec=pltpu.PrefetchScalarGridSpec(
            num_scalar_prefetch=0,
            grid=grid,
            in_specs=[
                pl.BlockSpec((C, 1), lambda s, n: (0, 0)),             # class weights
                pl.BlockSpec((C, tile_s), lambda s, n: (0, s)),        # pixel weights
                pl.BlockSpec((1, 1, tile_s), lambda s, n: (n, 0, s)),  # target labels
                pl.BlockSpec((1, C, tile_s), lambda s, n: (n, 0, s)),  # logits
            ],
            out_specs=pl.BlockSpec((1, 1, tile_s), lambda s, n: (s, 0, 0)),
        ),
        compiler_params=pltpu.CompilerParams(
            dimension_semantics=("parallel", "arbitrary")),
    )(cw2, w2, t3, x3)

    total = float(N) * float(C) * float(S)         # .mean() over N*C*D*H*W
    return jnp.sum(partials) / jnp.float32(total)


def _reference(logits, target, weights, class_weights):
    """Pure-JAX mirror of the PyTorch forward (quirks included)."""
    logp = jax.nn.log_softmax(logits.astype(jnp.float32), axis=1)
    C = logits.shape[1]
    onehot = jax.nn.one_hot(target, C, axis=1, dtype=jnp.float32)
    w = jnp.broadcast_to(weights[None].astype(jnp.float32), logits.shape)
    cw = class_weights.reshape(1, C, 1, 1, 1).astype(jnp.float32)
    res = -(cw * w) * onehot * logp
    return res.mean()


if __name__ == "__main__":
    # Small shapes; N == C is required by the reference's broadcast.
    # S = 4*6*20 = 480 (not a multiple of 128) to exercise the padded tail.
    N, C, D, H, W = 4, 4, 4, 6, 20

    key = jax.random.PRNGKey(0)
    k1, k2, k3 = jax.random.split(key, 3)
    logits = jax.random.normal(k1, (N, C, D, H, W), dtype=jnp.float32)
    target = jax.random.randint(k2, (N, D, H, W), 0, C, dtype=jnp.int32)
    pix_w = jax.random.uniform(k3, (N, D, H, W), dtype=jnp.float32)

    # Deterministic class weights (the registered buffer in __init__).
    class_weights = jnp.array([1.0, 0.5, 2.0, 1.5], dtype=jnp.float32)

    ref = _reference(logits, target, pix_w, class_weights)

    # 1) default auto-picked tile (single spatial tile here).
    loss = pixel_wise_cross_entropy_loss(logits, target, pix_w,
                                         class_weights=class_weights)
    loss = jax.block_until_ready(loss)
    np.testing.assert_allclose(np.asarray(loss), np.asarray(ref),
                               rtol=1e-4, atol=1e-6)

    # 2) forced small tile: multi-tile spatial grid + padded tail path.
    loss_t128 = pixel_wise_cross_entropy_loss(logits, target, pix_w,
                                              class_weights=class_weights,
                                              tile_s=128)
    loss_t128 = jax.block_until_ready(loss_t128)
    np.testing.assert_allclose(np.asarray(loss_t128), np.asarray(ref),
                               rtol=1e-4, atol=1e-6)

    # 3) default (None) class weights path.
    loss_nocw = pixel_wise_cross_entropy_loss(logits, target, pix_w)
    loss_nocw = jax.block_until_ready(loss_nocw)
    ref_nocw = _reference(logits, target, pix_w, jnp.ones((C,), jnp.float32))
    np.testing.assert_allclose(np.asarray(loss_nocw), np.asarray(ref_nocw),
                               rtol=1e-4, atol=1e-6)

    print("KERNEL_OK")
</pallas_src>

<mosaic_0001>
module attributes {stable_mosaic.version = 11 : i64} {
  func.func @_pwce_kernel(%arg0: i32, %arg1: i32, %arg2: memref<4x1xf32, #tpu.memory_space<vmem>>, %arg3: memref<4x512xf32, #tpu.memory_space<vmem>>, %arg4: memref<1x1x512xi32, #tpu.memory_space<vmem>>, %arg5: memref<1x4x512xf32, #tpu.memory_space<vmem>>, %arg6: memref<1x1x512xf32, #tpu.memory_space<vmem>>) attributes {dimension_semantics = [#tpu.dimension_semantics<parallel>, #tpu.dimension_semantics<arbitrary>], iteration_bounds = array<i64: 1, 4>, scalar_prefetch = 0 : i64, scratch_operands = 0 : i64, tpu.core_type = #tpu.core_type<tc>, window_params = [{pipeline_mode = #tpu.pipeline_mode<synchronous>, transform_indices = @transform_0, window_bounds = array<i64: 4, 1>}, {transform_indices = @transform_1, window_bounds = array<i64: 4, 512>}, {transform_indices = @transform_2, window_bounds = array<i64: 1, 1, 512>}, {transform_indices = @transform_3, window_bounds = array<i64: 1, 4, 512>}, {transform_indices = @transform_4, window_bounds = array<i64: 1, 1, 512>}]} {
    %c0_i32 = arith.constant 0 : i32
    %0 = arith.cmpi eq, %arg1, %c0_i32 : i32
    %1 = arith.extui %0 : i1 to i32
    %c0_i32_0 = arith.constant 0 : i32
    %2 = arith.cmpi ne, %1, %c0_i32_0 : i32
    scf.if %2 {
      %cst_21 = arith.constant 0.000000e+00 : f32
      %39 = vector.broadcast %cst_21 : f32 to vector<1x1x512xf32>
      %c0_22 = arith.constant 0 : index
      %c0_23 = arith.constant 0 : index
      %c0_24 = arith.constant 0 : index
      %40 = vector.load %arg6[%c0_22, %c0_23, %c0_24] : memref<1x1x512xf32, #tpu.memory_space<vmem>>, vector<1x1x512xf32>
      tpu.vector_store %arg6[%c0_22, %c0_23, %c0_24], %39 {strides = array<i32>} : memref<1x1x512xf32, #tpu.memory_space<vmem>>, vector<1x1x512xf32>,
    } else {
    }
    %c0 = arith.constant 0 : index
    %c0_1 = arith.constant 0 : index
    %c0_2 = arith.constant 0 : index
    %3 = vector.load %arg5[%c0, %c0_1, %c0_2] : memref<1x4x512xf32, #tpu.memory_space<vmem>>, vector<1x4x512xf32>
    %4 = vector.shape_cast %3 : vector<1x4x512xf32> to vector<4x512xf32>
    %cst = arith.constant dense<0xFF800000> : vector<512xf32>
    %5 = vector.multi_reduction <maximumf>, %4, %cst [0] : vector<4x512xf32> to vector<512xf32>
    %6 = vector.shape_cast %5 : vector<512xf32> to vector<1x512xf32>
    %7 = vector.broadcast %6 : vector<1x512xf32> to vector<4x512xf32>
    %8 = arith.subf %4, %7 : vector<4x512xf32>
    %9 = math.exp %8 : vector<4x512xf32>
    %cst_3 = arith.constant dense<0.000000e+00> : vector<512xf32>
    %10 = vector.multi_reduction <add>, %9, %cst_3 [0] : vector<4x512xf32> to vector<512xf32>
    %11 = vector.shape_cast %10 : vector<512xf32> to vector<1x512xf32>
    %12 = math.log %11 : vector<1x512xf32>
    %c0_4 = arith.constant 0 : index
    %c0_5 = arith.constant 0 : index
    %c0_6 = arith.constant 0 : index
    %13 = vector.load %arg4[%c0_4, %c0_5, %c0_6] : memref<1x1x512xi32, #tpu.memory_space<vmem>>, vector<1x1x512xi32>
    %14 = vector.shape_cast %13 : vector<1x1x512xi32> to vector<1x512xi32>
    %15 = tpu.iota {dimensions = array<i32: 0>} : vector<4x512xi32>
    %16 = vector.broadcast %14 : vector<1x512xi32> to vector<4x512xi32>
    %17 = arith.cmpi eq, %15, %16 : vector<4x512xi32>
    %cst_7 = arith.constant 0.000000e+00 : f32
    %18 = vector.broadcast %cst_7 : f32 to vector<4x512xf32>
    %19 = arith.select %17, %4, %18 : vector<4x512xi1>, vector<4x512xf32>
    %cst_8 = arith.constant dense<0.000000e+00> : vector<512xf32>
    %20 = vector.multi_reduction <add>, %19, %cst_8 [0] : vector<4x512xf32> to vector<512xf32>
    %21 = vector.shape_cast %20 : vector<512xf32> to vector<1x512xf32>
    %c0_9 = arith.constant 0 : index
    %c0_10 = arith.constant 0 : index
    %22 = vector.load %arg2[%c0_9, %c0_10] : memref<4x1xf32, #tpu.memory_space<vmem>>, vector<4x1xf32>
    %c0_11 = arith.constant 0 : index
    %c0_12 = arith.constant 0 : index
    %23 = vector.load %arg3[%c0_11, %c0_12] : memref<4x512xf32, #tpu.memory_space<vmem>>, vector<4x512xf32>
    %24 = vector.broadcast %22 : vector<4x1xf32> to vector<4x512xf32>
    %25 = arith.mulf %24, %23 : vector<4x512xf32>
    %cst_13 = arith.constant 0.000000e+00 : f32
    %26 = vector.broadcast %cst_13 : f32 to vector<4x512xf32>
    %27 = arith.select %17, %25, %26 : vector<4x512xi1>, vector<4x512xf32>
    %cst_14 = arith.constant dense<0.000000e+00> : vector<512xf32>
    %28 = vector.multi_reduction <add>, %27, %cst_14 [0] : vector<4x512xf32> to vector<512xf32>
    %29 = vector.shape_cast %28 : vector<512xf32> to vector<1x512xf32>
    %c0_15 = arith.constant 0 : index
    %c0_16 = arith.constant 0 : index
    %c0_17 = arith.constant 0 : index
    %30 = vector.load %arg6[%c0_15, %c0_16, %c0_17] : memref<1x1x512xf32, #tpu.memory_space<vmem>>, vector<1x1x512xf32>
    %31 = vector.shape_cast %30 : vector<1x1x512xf32> to vector<1x512xf32>
    %32 = arith.addf %6, %12 : vector<1x512xf32>
    %33 = arith.subf %32, %21 : vector<1x512xf32>
    %34 = arith.mulf %29, %33 : vector<1x512xf32>
    %35 = arith.addf %31, %34 : vector<1x512xf32>
    %c0_18 = arith.constant 0 : index
    %c0_19 = arith.constant 0 : index
    %c0_20 = arith.constant 0 : index
    %36 = vector.load %arg6[%c0_18, %c0_19, %c0_20] : memref<1x1x512xf32, #tpu.memory_space<vmem>>, vector<1x1x512xf32>
    %37 = vector.shape_cast %36 : vector<1x1x512xf32> to vector<1x512xf32>
    %38 = vector.shape_cast %35 : vector<1x512xf32> to vector<1x1x512xf32>
    tpu.vector_store %arg6[%c0_18, %c0_19, %c0_20], %38 {strides = array<i32>} : memref<1x1x512xf32, #tpu.memory_space<vmem>>, vector<1x1x512xf32>,
    return
  }
  func.func @transform_0(%arg0: i32, %arg1: i32) -> (i32, i32) {
    %c0_i32 = arith.constant 0 : i32
    %c0_i32_0 = arith.constant 0 : i32
    %c0_i32_1 = arith.constant 0 : i32
    return %c0_i32, %c0_i32_0 : i32, i32
  }
  func.func @transform_1(%arg0: i32, %arg1: i32) -> (i32, i32) {
    %c0_i32 = arith.constant 0 : i32
    %c0_i32_0 = arith.constant 0 : i32
    return %c0_i32, %arg0 : i32, i32
  }
  func.func @transform_2(%arg0: i32, %arg1: i32) -> (i32, i32, i32) {
    %c0_i32 = arith.constant 0 : i32
    %c0_i32_0 = arith.constant 0 : i32
    return %arg1, %c0_i32, %arg0 : i32, i32, i32
  }
  func.func @transform_3(%arg0: i32, %arg1: i32) -> (i32, i32, i32) {
    %c0_i32 = arith.constant 0 : i32
    %c0_i32_0 = arith.constant 0 : i32
    return %arg1, %c0_i32, %arg0 : i32, i32, i32
  }
  func.func @transform_4(%arg0: i32, %arg1: i32) -> (i32, i32, i32) {
    %c0_i32 = arith.constant 0 : i32
    %c0_i32_0 = arith.constant 0 : i32
    %c0_i32_1 = arith.constant 0 : i32
    return %arg0, %c0_i32, %c0_i32_0 : i32, i32, i32
  }
}

</mosaic_0001>

<bundles_post_ra>
// kernel: tpu_custom_call.1
= control target key start
LH: loop header
LB: loop body
LE: loop exit
PB: predicated region body
PF: predicated region fallthrough
CT: control target
= control target key end

     0   :  { %9 = vsyncpa [#allocation3], 0  ;;  %s1305_s0 = inlined_call_operand.vmem [shape: f32[4,1], index: 0, kind: input, shape index: {}]   ;;  %s1306_s1 = inlined_call_operand.hbm [shape: f32[4,512], index: 1, kind: input, shape index: {}]   ;;  %s1307_s2 = inlined_call_operand.hbm [shape: s32[4,1,512], index: 2, kind: input, shape index: {}]   ;;  %s1308_s3 = inlined_call_operand.hbm [shape: f32[4,4,512], index: 3, kind: input, shape index: {}]   ;;  %s1309_s4 = inlined_call_operand.hbm [shape: f32[1,1,512], index: 4, kind: output, shape index: {}]  }
   0x1   :  { %10 = vsyncpa [#allocation6], 0 }
   0x2   :  { %12 = vsyncpa [#allocation6 + $0x1], 0 }
   0x3   :  { %13 = vsyncpa [#allocation4], 0  ;;  %s977_s15 = smov 0   ;;  %s979_s16 = smov 0  }
   0x4   :  { %s981_s17 = smov 0   ;;  %s983_s18 = smov 0  }
   0x5   :  { %s985_s19 = smov 0   ;;  %s987_s20 = smov 0  }
   0x6 LB: > { %s28_s21 = sadd.s32 1, %s939_s19  ;;  %s87_s22 = sadd.s32 1, %s931_s17  ;;  %s943_s20 = sphi %s987_s20, %s19_s20   ;;  %s939_s19 = sphi %s985_s19, %s1327_s19   ;;  %s935_s18 = sphi %s983_s18, %s1326_s18   ;;  %s931_s17 = sphi %s981_s17, %s1325_s17   ;;  %s927_s16 = sphi %s979_s16, %s1324_s16   ;;  %s923_s15 = sphi %s977_s15, %s1323_s15  }
   0x7   : > { %p29_p0 = scmp.ge.s32.totalorder %s28_s21, 4  ;;  %p94_p1 = scmp.ne.s32.totalorder %s931_s17, %s927_s16 }
   0x8   : > { %p95_p2 = scmp.eq.s32.totalorder %s943_s20, 0  ;;  %p697_p4 = scmp.lt.s32.totalorder %s943_s20, 4 }
   0x9   : > { %s1329_s21 = smov (%p29_p0, %s28_s21), 0  ;;  %s195_s24 = sand.u32 1, %s943_s20  }
   0xa   : > { %p96_p3 = por %p95_p2, %p94_p1  ;;  %s82_s23 = ssub.s32 %s939_s19, %s1329_s21 }
   0xb   : > { %p85_p5 = scmp.eq.s32.totalorder %s82_s23, 0  ;;  %s197_s25 = sand.u32 1, %s931_s17  }
   0xc   : > { %s671_s26 = sshll.u32 %s939_s19, 6  ;;  %s656_s28 = sshll.u32 %s197_s25, 2 }
   0xd   : > { %s1021_s27 = scalar_select %p85_p5, %s931_s17, %s87_s22  }
   0xe   : > { %s1026_s5 = scalar_lea.hbm %s1307_s2, %s671_s26  ;;  %p1028_p6 = pnand %p697_p4, %p96_p3 }
   0xf   : > { %s199_s7 = scalar_lea.vmem [#allocation5], %s656_s28  ;;  %s1032_s9 = sshll.u32 %s197_s25, 4 }
  0x10   : > { %s209_s8 = sshll.u32 %s199_s7, 4  ;;  %s1036_s10 = scalar_lea.sflag [#allocation6], %s195_s24  ;;  %s1034_s8 = int_to_ptr.vmem [resolvable:$true] %s209_s8 }
  0x11   : > { %s771_s11 = scalar_lea.hbm %s1026_s5, 64  ;;  %p773_p8 = pneg %p1028_p6 }
  0x12   : > { %p772_p7 = scmp.ne.s32.totalorder %s1026_s5, %s771_s11  ;;  %s776_s14 = scalar_lea.hbm %s1307_s2, 256 }
  0x13   : > { %p777_p11 = scmp.lt.u32.totalorder %s1026_s5, %s1307_s2  ;;  %p778_p12 = scmp.lt.u32.totalorder %s776_s14, %s771_s11 }
  0x14   : > { %p774_p9 = pnand %p773_p8, %p772_p7  ;;  %p780_p0 = scmp.lt.u32.totalorder %s771_s11, %s1026_s5 }
  0x15   : > { %p779_p13 = por %p778_p12, %p777_p11 }
  0x16   : > { %p775_p10 = pneg %p774_p9 }
  0x17   : > { %p781_p1 = por %p780_p0, %p779_p13 }
  0x19   : > { %p782_p2 = pnand %p781_p1, %p775_p10 }
  0x1b   : > { %785 = shalt.err (!%p782_p2)
}
  0x1c   : > { %s786_s24 = scalar_lea.vmem %s1034_s8, 64  ;;  %s945_s25 = smov [#allocation5]  }
  0x1d   : > { %p787_p3 = scmp.ne.s32.totalorder %s1034_s8, %s786_s24  ;;  %s791_s26 = sshll.u32 %s945_s25, 4  ;;  %s792_s26 = int_to_ptr.vmem [resolvable:$false] %s791_s26 }
  0x1e   : > { %s793_s28 = scalar_lea.vmem %s792_s26, 128  ;;  %p794_p7 = scmp.lt.s32.totalorder %s1034_s8, %s792_s26 }
  0x1f   : > { %p789_p4 = pnand %p787_p3, %p773_p8  ;;  %p795_p9 = scmp.lt.s32.totalorder %s793_s28, %s786_s24 }
  0x21   : > { %p790_p5 = pneg %p789_p4  ;;  %p796_p11 = por %p795_p9, %p794_p7 }
  0x23   : > { %p797_p12 = pnand %p796_p11, %p790_p5 }
  0x25   : > { %800 = shalt.err (!%p797_p12)
}
  0x26   : > { %692 = dma.hbm_to_vmem [thread:$0]  (!%p1028_p6), %s1026_s5, 64, %s1034_s8, %s1036_s10  }
  0x27   : > { %s1065_s29 = sadd.s32 4294967295, %s943_s20   ;;  %p100_p10 = scmp.ne.s32.totalorder %s927_s16, %s923_s15 }
  0x28   : > { %p1310_p13 = scmp.eq.s32.totalorder %s1065_s29, 0  ;;  %p653_p0 = scmp.ge.s32.totalorder %s943_s20, 1 }
  0x29   : > { %p165_p1 = scmp.lt.s32.totalorder %s943_s20, 5  ;;  %s946_s5 = smov [#allocation2]  }
  0x2a   : > { %p1074_p2 = por %p1310_p13, %p100_p10  ;;  %s184_s8 = sshll.u32 %s946_s5, 4  ;;  %s1082_s8 = int_to_ptr.vmem [resolvable:$true] %s184_s8 }
  0x2b   : > { %p1078_p3 = pnand %p653_p0, %p165_p1  ;;  %s672_s15 = sshll.u32 %s939_s19, 8 }
  0x2c   : > { %s1315_s30 = scalar_select %p1074_p2, 1, 0 }
  0x2d   : > { %s1316_s7 = scalar_select %p1078_p3, 1, 0 }
  0x2e   : > { %p685_p4 = pneg %p1078_p3  ;;  %s1090_s13 = scalar_lea.hbm %s1308_s3, %s672_s15 }
  0x2f   : > { %s220_s14 = scalar_lea.vmem [#allocation7], %s1032_s9  ;;  %s801_s24 = scalar_lea.hbm %s1090_s13, 256 }
  0x30   : > { %s230_s22 = sshll.u32 %s220_s14, 4  ;;  %p1095_p5 = pnand %p685_p4, %p1310_p13  ;;  %s231_s22 = int_to_ptr.vmem [resolvable:$true] %s230_s22 }
  0x31   : > { %p802_p7 = scmp.ne.s32.totalorder %s1090_s13, %s801_s24  ;;  %s806_s28 = scalar_lea.hbm %s1308_s3, 1024 }
  0x32   : > { %s1317_s23 = scalar_select %p1095_p5, 1, 0 }
  0x33   : > { %p804_p9 = pnand %p802_p7, %p773_p8  ;;  %p807_p12 = scmp.lt.u32.totalorder %s1090_s13, %s1308_s3 }
  0x34   : > { %p808_p10 = scmp.lt.u32.totalorder %s806_s28, %s801_s24  ;;  %p810_p1 = scmp.lt.u32.totalorder %s801_s24, %s1090_s13 }
  0x35   : > { %p805_p11 = pneg %p804_p9 }
  0x36   : > { %p809_p0 = por %p808_p10, %p807_p12 }
  0x38   : > { %p811_p4 = por %p810_p1, %p809_p0 }
  0x3a   : > { %p812_p13 = pnand %p811_p4, %p805_p11 }
  0x3c   : > { %815 = shalt.err (!%p812_p13)
}
  0x3d   : > { %s816_s9 = scalar_lea.vmem %s231_s22, 256  ;;  %s947_s11 = smov [#allocation7]  }
  0x3e   : > { %p817_p2 = scmp.ne.s32.totalorder %s231_s22, %s816_s9  ;;  %s821_s12 = sshll.u32 %s947_s11, 4  ;;  %s822_s12 = int_to_ptr.vmem [resolvable:$false] %s821_s12 }
  0x3f   : > { %s823_s14 = scalar_lea.vmem %s822_s12, 512  ;;  %p824_p3 = scmp.lt.s32.totalorder %s231_s22, %s822_s12 }
  0x40   : > { %p819_p7 = pnand %p817_p2, %p773_p8  ;;  %p825_p5 = scmp.lt.s32.totalorder %s823_s14, %s816_s9 }
  0x42   : > { %p820_p9 = pneg %p819_p7  ;;  %p826_p10 = por %p825_p5, %p824_p3 }
  0x44   : > { %p827_p12 = pnand %p826_p10, %p820_p9 }
  0x46   : > { %830 = shalt.err (!%p827_p12)
}
  0x47   : > { %695 = dma.hbm_to_vmem [thread:$0]  (!%p1028_p6), %s1090_s13, 256, %s231_s22, %s1036_s10  }
  0x48   : > { %s831_s26 = scalar_lea.hbm %s1306_s1, 256  ;;  %p1318_p13 = scmp.ne.s32.totalorder %s1317_s23, 0 }
  0x49   : > { %p832_p8 = scmp.ne.s32.totalorder %s1306_s1, %s831_s26  ;;  %p838_p5 = scmp.lt.u32.totalorder %s831_s26, %s1306_s1 }
  0x4a   : > { %p833_p2 = pneg %p1318_p13 }
  0x4c   : > { %p834_p11 = pnand %p833_p2, %p832_p8 }
  0x4e   : > { %p835_p3 = pneg %p834_p11 }
  0x50   : > { %p840_p0 = pnand %p838_p5, %p835_p3 }
  0x52   : > { %843 = shalt.err (!%p840_p0)
}
  0x53   : > { %s844_s6 = scalar_lea.vmem %s1082_s8, 256  ;;  %p852_p7 = scmp.lt.s32.totalorder %s1082_s8, %s1082_s8 }
  0x54   : > { %p845_p6 = scmp.ne.s32.totalorder %s1082_s8, %s844_s6  ;;  %p853_p9 = scmp.lt.s32.totalorder %s844_s6, %s844_s6 }
  0x56   : > { %p847_p1 = pnand %p845_p6, %p833_p2  ;;  %p854_p10 = por %p853_p9, %p852_p7 }
  0x58   : > { %p848_p4 = pneg %p847_p1 }
  0x5a   : > { %p855_p12 = pnand %p854_p10, %p848_p4 }
  0x5c   : > { %858 = shalt.err (!%p855_p12)
}
  0x5d   : > { %688 = dma.hbm_to_vmem [thread:$0]  (!%p1318_p13), %s1306_s1, 256, %s1082_s8, [#allocation3]  }
  0x5e   : > { %p1319_p8 = scmp.ne.s32.totalorder %s1316_s7, 0 }
  0x5f   : > { %p1320_p11 = scmp.eq.s32.totalorder (!%p1319_p8), %s1065_s29, 0 }
  0x60   : > { %239 = sbr.rel (%p1319_p8) target bundleno = 291 (0x123), region = 36 }
  0x67   : > { %910 = dma.done.wait (%p1320_p11), [#allocation3], 256   ;;  %p1321_p2 = pmov %p1320_p11 }
  0x68   : > { %s245_s22 = sand.u32 1, %s1065_s29   ;;  %s247_s11 = sand.u32 1, %s927_s16  }
  0x69   : > { %912 = vsyncadd (%p1321_p2), [#allocation3], 4294967040  ;;  %s1148_s23 = sshll.u32 %s247_s11, 2  ;;  %s246_s12 = scalar_lea.sflag [#allocation6], %s245_s22 }
  0x6a   : > { %s249_s14 = scalar_lea.vmem [#allocation5], %s1148_s23  ;;  %p1322_p13 = scmp.ne.s32.totalorder %s1315_s30, 0 }
  0x6c   : > { %914 = dma.done.wait (%p1322_p13), %s246_s12, 320  }
  0x6d   : > { %916 = vsyncadd (%p1322_p13), %s246_s12, 4294966976  ;;  %s665_s7 = sshll.u32 %s247_s11, 4  ;;  %p666_p3 = scmp.ne.s32.totalorder %s935_s18, 0 }
  0x6e   : > { %s258_s8 = scalar_lea.vmem [#allocation7], %s665_s7  ;;  %v290_v0 = vlaneseq (!%p666_p3)  ;;  %v948_v1 = vmov (!%p666_p3), 0.0  }
  0x6f   : > { %289 = sbr.rel (%p666_p3) target bundleno = 118 (0x76), region = 52 }
  0x70   : > { %vm292_vm0 = vcmp.lt.s32.totalorder (!%p666_p3), %v290_v0, 512 }
  0x71   : > { %294 = vst.msk [vmem:[#allocation8] sm:$0xf] (!%p666_p3), %vm292_vm0, %v948_v1 }
  0x76 PF: > { %v443_v2 = vld [vmem:[%s1305_s0] sm:$0xf]  ;;  %v949_v3 = vmov 0   ;;  %v1161_v5 = vld [vmem:[%s258_s8 + $0x8] sm:$0xff]  ;;  %vm303_vm1 = vcmask 1043456   ;;  %v389_v46 = vlaneseq  ;;  %s951_s18 = smov [#allocation8]  }
  0x77   : > { %754 = vset.pattern.permute.xlu0 %v949_v3  ;;  %v1159_v4 = vld [vmem:[%s258_s8] sm:$0xff]  ;;  %v1169_v7 = vcombine.high %v1161_v5, %v1161_v5  ;;  %v318_v10 = vsel %vm303_vm1, %v1161_v5, -inf  ;;  %v388_v59 = vld [vmem:[%s249_s14] sm:$0xf]  ;;  %s551_s30 = sshll.u32 %s951_s18, 4  ;;  %p699_p5 = scmp.eq.s32.totalorder %s1065_s29, 3  ;;  %s552_s30 = int_to_ptr.vmem [resolvable:$true] %s551_s30 }
  0x78   : > { %448 = vperm.xlu0 %754, %v443_v2   ;;  %v1165_v6 = vcombine.high %v1159_v4, %v1159_v4  ;;  %v304_v8 = vsel %vm303_vm1, %v1159_v4, -inf  ;;  %v319_v14 = vrot.slane %v318_v10, 4  ;;  %v1198_v52 = vshrl.u32 %v389_v46, 7  ;;  %s859_s26 = scalar_lea.vmem %s552_s30, 64  ;;  %p866_p4 = scmp.lt.s32.totalorder %s552_s30, %s552_s30 }
  0x79   : > { %v325_v11 = vsel %vm303_vm1, %v1169_v7, -inf  ;;  %v305_v12 = vrot.slane %v304_v8, 4  ;;  %vm538_vm6 = vcmp.lt.s32.totalorder %v389_v46, 512  ;;  %p860_p0 = scmp.ne.s32.totalorder %s552_s30, %s859_s26  ;;  %p867_p7 = scmp.lt.s32.totalorder %s859_s26, %s859_s26 }
  0x7a   : > { %v311_v9 = vsel %vm303_vm1, %v1165_v6, -inf  ;;  %v326_v15 = vrot.slane %v325_v11, 4  ;;  %v320_v18 = vmax.f32 %v318_v10, %v319_v14  ;;  %v393_v57 = vsub.s32 0, %v1198_v52 }
  0x7b   : > { %v312_v13 = vrot.slane %v311_v9, 4  ;;  %v306_v16 = vmax.f32 %v304_v8, %v305_v12  ;;  %v397_v60 = vsub.s32 1, %v1198_v52  ;;  %v401_v61 = vsub.s32 2, %v1198_v52  ;;  %p861_p6 = pnand %p860_p0, %p699_p5  ;;  %p868_p9 = por %p867_p7, %p866_p4 }
  0x7c   : > { %v327_v19 = vmax.f32 %v325_v11, %v326_v15  ;;  %v321_v22 = vrot.slane %v320_v18, 2  ;;  %v405_v62 = vsub.s32 3, %v1198_v52  ;;  %v1206_v2 = vrot.slane %v388_v59, %v393_v57 }
  0x7d   : > { %v313_v17 = vmax.f32 %v311_v9, %v312_v13  ;;  %v307_v20 = vrot.slane %v306_v16, 2  ;;  %v1208_v8 = vrot.slane %v388_v59, %v397_v60  ;;  %v1210_v9 = vrot.slane %v388_v59, %v401_v61  ;;  %p862_p1 = pneg %p861_p6 }
  0x7e   : > { %v328_v23 = vrot.slane %v327_v19, 2  ;;  %v322_v26 = vmax.f32 %v320_v18, %v321_v22  ;;  %v1212_v10 = vrot.slane %v388_v59, %v405_v62  ;;  %vm407_vm2 = vcmp.eq.s32.totalorder %v1198_v52, %v1206_v2 }
  0x7f   : > { %v314_v21 = vrot.slane %v313_v17, 2  ;;  %v308_v24 = vmax.f32 %v306_v16, %v307_v20  ;;  %vm408_vm3 = vcmp.eq.s32.totalorder %v1198_v52, %v1208_v8  ;;  %vm409_vm4 = vcmp.eq.s32.totalorder %v1198_v52, %v1210_v9  ;;  %p869_p10 = pnand %p868_p9, %p862_p1 }
  0x80   : > { %v329_v27 = vmax.f32 %v327_v19, %v328_v23  ;;  %v323_v30 = vrot.slane %v322_v26, 1  ;;  %vm410_vm5 = vcmp.eq.s32.totalorder %v1198_v52, %v1212_v10  ;;  %v412_v19 = vsel %vm408_vm3, %v1165_v6, 0.0 }
  0x81   : > { %v315_v25 = vmax.f32 %v313_v17, %v314_v21  ;;  %v309_v28 = vrot.slane %v308_v24, 1  ;;  %v411_v17 = vsel %vm407_vm2, %v1159_v4, 0.0  ;;  %v413_v20 = vsel %vm409_vm4, %v1161_v5, 0.0 }
  0x82   : > { %v330_v31 = vrot.slane %v329_v27, 1  ;;  %v1183_v34 = vmax.f32 %v322_v26, %v323_v30  ;;  %v414_v21 = vsel %vm410_vm5, %v1169_v7, 0.0  ;;  %v429_v26 = vsel %vm303_vm1, %v413_v20, 0.0 }
  0x83   : > { %v316_v29 = vrot.slane %v315_v25, 1  ;;  %v1179_v32 = vmax.f32 %v308_v24, %v309_v28  ;;  %v436_v6 = vsel %vm303_vm1, %v414_v21, 0.0 }
  0x84   : > { %v1185_v35 = vmax.f32 %v329_v27, %v330_v31  ;;  %v430_v31 = vrot.slane %v429_v26, 4 }
  0x85   : > { %v1181_v33 = vmax.f32 %v315_v25, %v316_v29  ;;  %v422_v25 = vsel %vm303_vm1, %v412_v19, 0.0 }
  0x86   : > { %v337_v37 = vcombine.low %v1183_v34, %v1185_v35  ;;  %v423_v30 = vrot.slane %v422_v25, 4 }
  0x87   : > { %v336_v36 = vcombine.low %v1179_v32, %v1181_v33 }
  0x88   : > { %v341_v39 = vsub.f32 %v1161_v5, %v337_v37 }
  0x89   : > { %v340_v38 = vsub.f32 %v1159_v4, %v336_v36  ;;  %v415_v4 = vsel %vm303_vm1, %v411_v17, 0.0  ;;  %v437_v36 = vrot.slane %v436_v6, 4 }
  0x8a   : > { %v344_v41 = vmul.f32 1.442695, %v341_v39  ;;  %v416_v29 = vrot.slane %v415_v4, 4  ;;  %v431_v39 = vadd.f32 %v430_v31, %v429_v26 }
  0x8b   : > { %v342_v40 = vmul.f32 1.442695, %v340_v38  ;;  %v424_v38 = vadd.f32 %v423_v30, %v422_v25 }
  0x8c   : > { %v417_v7 = vadd.f32 %v416_v29, %v415_v4 }
  0x8d   : > { %759 = vpow2.f32 %v342_v40  ;;  %v438_v40 = vadd.f32 %v437_v36, %v436_v6 }
  0x8e   : > { %761 = vpow2.f32 %v344_v41  ;;  %v418_v41 = vrot.slane %v417_v7, 2 }
  0x97   : > { %v760_v42 = vpop.eup %759 }
  0x98   : > { %v762_v43 = vpop.eup %761  ;;  %v348_v44 = vcombine.high %v760_v42, %v760_v42  ;;  %v352_v47 = vsel %vm303_vm1, %v760_v42, 0.0  ;;  %v425_v42 = vrot.slane %v424_v38, 2 }
  0x99   : > { %v349_v45 = vcombine.high %v762_v43, %v762_v43  ;;  %v366_v48 = vsel %vm303_vm1, %v762_v43, 0.0  ;;  %v353_v50 = vrot.slane %v352_v47, 4  ;;  %v432_v43 = vrot.slane %v431_v39, 2 }
  0x9a   : > { %v359_v49 = vsel %vm303_vm1, %v348_v44, 0.0  ;;  %v367_v53 = vrot.slane %v366_v48, 4  ;;  %v439_v44 = vrot.slane %v438_v40, 2 }
  0x9b   : > { %v373_v51 = vsel %vm303_vm1, %v349_v45, 0.0  ;;  %v360_v54 = vrot.slane %v359_v49, 4  ;;  %v354_v56 = vadd.f32 %v353_v50, %v352_v47  ;;  %v444_v45 = vld [vmem:[#allocation2] sm:$0xff]  ;;  %v445_v47 = vld [vmem:[#allocation2 + $0x8] sm:$0xff]  ;;  %v426_v50 = vadd.f32 %v425_v42, %v424_v38 }
  0x9c   : > { %v374_v55 = vrot.slane %v373_v51, 4  ;;  %v368_v58 = vadd.f32 %v367_v53, %v366_v48  ;;  %v419_v48 = vadd.f32 %v418_v41, %v417_v7  ;;  %v440_v53 = vadd.f32 %v439_v44, %v438_v40 }
  0x9d   : > { %v361_v63 = vadd.f32 %v360_v54, %v359_v49  ;;  %v355_v1 = vrot.slane %v354_v56, 2  ;;  %v427_v62 = vrot.slane %v426_v50, 1 }
  0x9e   : > { %v375_v0 = vadd.f32 %v374_v55, %v373_v51  ;;  %v369_v3 = vrot.slane %v368_v58, 2  ;;  %v433_v51 = vadd.f32 %v432_v43, %v431_v39  ;;  %v453_v55 = vcombine.high %v444_v45, %v444_v45 }
  0x9f   : > { %v362_v11 = vrot.slane %v361_v63, 2  ;;  %v356_v13 = vadd.f32 %v355_v1, %v354_v56  ;;  %v454_v56 = vcombine.high %v445_v47, %v445_v47  ;;  %v420_v59 = vrot.slane %v419_v48, 1 }
  0xa0   : > { %v376_v12 = vrot.slane %v375_v0, 2  ;;  %v370_v14 = vadd.f32 %v369_v3, %v368_v58 }
  0xa1   : > { %v363_v15 = vadd.f32 %v362_v11, %v361_v63  ;;  %v357_v18 = vrot.slane %v356_v13, 1  ;;  %v434_v63 = vrot.slane %v433_v51, 1  ;;  %v421_v6 = vadd.f32 %v420_v59, %v419_v48 }
  0xa2   : > { %v377_v16 = vadd.f32 %v376_v12, %v375_v0  ;;  %v371_v22 = vrot.slane %v370_v14, 1  ;;  %v441_v0 = vrot.slane %v440_v53, 1 }
  0xa3   : > { %v364_v23 = vrot.slane %v363_v15, 1  ;;  %v358_v27 = vadd.f32 %v357_v18, %v356_v13  ;;  %v435_v9 = vadd.f32 %v434_v63, %v433_v51 }
  0xa4   : > { %v378_v24 = vrot.slane %v377_v16, 1  ;;  %v372_v28 = vadd.f32 %v371_v22, %v370_v14 }
  0xa5   : > { %v365_v5 = vadd.f32 %v364_v23, %v363_v15  ;;  %763 = vlog2.f32 %v358_v27  ;;  %v428_v27 = vadd.f32 %v427_v62, %v426_v50 }
  0xa6   : > { %v379_v37 = vadd.f32 %v378_v24, %v377_v16  ;;  %765 = vlog2.f32 %v372_v28  ;;  %v950_v16 = vmov 1966171168   ;;  %v442_v28 = vadd.f32 %v441_v0, %v440_v53 }
  0xa7   : > { %767 = vlog2.f32 %v365_v5  ;;  %v513_v17 = vunpack.c.l.s4 %v950_v16 }
  0xa8   : > { %769 = vlog2.f32 %v379_v37 }
  0xa9   : > { %v514_v42 = vunpack.c.0.s8 %v513_v17 }
  0xaf   : > { %v764_v49 = vpop.eup %763 }
  0xb0   : > { %v766_v54 = vpop.eup %765  ;;  %v381_v61 = vmul.f32 0.6931472, %v764_v49 }
  0xb1   : > { %v768_v57 = vpop.eup %767  ;;  %v385_v14 = vmul.f32 0.6931472, %v766_v54 }
  0xb2   : > { %v770_v58 = vpop.eup %769  ;;  %v383_v13 = vmul.f32 0.6931472, %v768_v57  ;;  %v494_v31 = vadd.f32 %v381_v61, %v1179_v32  ;;  %v517_v57 = vsub.s32 %v514_v42, %v1198_v52 }
  0xb3   : > { %v387_v15 = vmul.f32 0.6931472, %v770_v58  ;;  %v496_v37 = vadd.f32 %v385_v14, %v1183_v34 }
  0xb4   : > { %v495_v36 = vadd.f32 %v383_v13, %v1181_v33  ;;  %v498_v48 = vsub.f32 %v494_v31, %v421_v6 }
  0xb5   : > { %v497_v7 = vadd.f32 %v387_v15, %v1185_v35  ;;  %v500_v50 = vsub.f32 %v496_v37, %v435_v9 }
  0xb6   : > { %v499_v49 = vsub.f32 %v495_v36, %v428_v27 }
  0xb7   : > { %v501_v51 = vsub.f32 %v497_v7, %v442_v28 }
  0xf7   : > { %v449_v60 = vpop.permute.xlu0 %448 }
  0xf8   : > { %v457_v1 = vmul.f32 %v449_v60, %v444_v45  ;;  %v458_v3 = vmul.f32 %v453_v55, %v449_v60  ;;  %v459_v11 = vmul.f32 %v449_v60, %v445_v47  ;;  %v460_v12 = vmul.f32 %v454_v56, %v449_v60 }
  0xfa   : > { %v461_v18 = vsel %vm407_vm2, %v457_v1, 0.0  ;;  %v462_v19 = vsel %vm408_vm3, %v458_v3, 0.0  ;;  %v463_v20 = vsel %vm409_vm4, %v459_v11, 0.0  ;;  %v464_v21 = vsel %vm410_vm5, %v460_v12, 0.0  ;;  %v493_v11 = vld [vmem:[#allocation8] sm:$0xf] }
  0xfb   : > { %v465_v22 = vsel %vm303_vm1, %v461_v18, 0.0  ;;  %v472_v23 = vsel %vm303_vm1, %v462_v19, 0.0  ;;  %v479_v4 = vsel %vm303_vm1, %v463_v20, 0.0  ;;  %v486_v2 = vsel %vm303_vm1, %v464_v21, 0.0 }
  0xfc   : > { %v466_v24 = vrot.slane %v465_v22, 4  ;;  %v473_v25 = vrot.slane %v472_v23, 4  ;;  %v480_v8 = vrot.slane %v479_v4, 4  ;;  %v487_v26 = vrot.slane %v486_v2, 4 }
  0xfe   : > { %v467_v29 = vadd.f32 %v466_v24, %v465_v22  ;;  %v474_v5 = vadd.f32 %v473_v25, %v472_v23  ;;  %v481_v10 = vadd.f32 %v480_v8, %v479_v4  ;;  %v488_v30 = vadd.f32 %v487_v26, %v486_v2 }
 0x100   : > { %v468_v38 = vrot.slane %v467_v29, 2  ;;  %v475_v39 = vrot.slane %v474_v5, 2  ;;  %v482_v40 = vrot.slane %v481_v10, 2  ;;  %v489_v41 = vrot.slane %v488_v30, 2 }
 0x102   : > { %v469_v43 = vadd.f32 %v468_v38, %v467_v29  ;;  %v476_v44 = vadd.f32 %v475_v39, %v474_v5  ;;  %v483_v45 = vadd.f32 %v482_v40, %v481_v10  ;;  %v490_v47 = vadd.f32 %v489_v41, %v488_v30 }
 0x104   : > { %v470_v32 = vrot.slane %v469_v43, 1  ;;  %v477_v53 = vrot.slane %v476_v44, 1  ;;  %v484_v33 = vrot.slane %v483_v45, 1  ;;  %v491_v54 = vrot.slane %v490_v47, 1 }
 0x106   : > { %v471_v34 = vadd.f32 %v470_v32, %v469_v43  ;;  %v478_v55 = vadd.f32 %v477_v53, %v476_v44  ;;  %v485_v35 = vadd.f32 %v484_v33, %v483_v45  ;;  %v492_v56 = vadd.f32 %v491_v54, %v490_v47 }
 0x108   : > { %v502_v58 = vmul.f32 %v498_v48, %v471_v34  ;;  %v503_v59 = vmul.f32 %v499_v49, %v478_v55  ;;  %v504_v60 = vmul.f32 %v500_v50, %v485_v35  ;;  %v505_v61 = vmul.f32 %v501_v51, %v492_v56 }
 0x10a   : > { %v510_v62 = vcombine.low %v502_v58, %v503_v59  ;;  %v511_v63 = vcombine.low %v504_v60, %v505_v61 }
 0x10c   : > { %v518_v0 = vrot.slane %v510_v62, %v517_v57  ;;  %v525_v1 = vrot.slane %v511_v63, %v517_v57 }
 0x10e   : > { %v526_v3 = vcombine.low %v518_v0, %v525_v1 }
 0x110   : > { %v533_v12 = vrot.slane %v526_v3, %v517_v57 }
 0x112   : > { %v535_v13 = vadd.f32 %v533_v12, %v493_v11 }
 0x114   : > { %540 = vst.msk [vmem:[#allocation8] sm:$0xf] %vm538_vm6, %v535_v13 }
 0x115   : > { %872 = shalt.err (!%p869_p10)
}
 0x116   : > { %s873_s15 = scalar_lea.hbm %s1309_s4, 64 }
 0x117   : > { %p874_p12 = scmp.ne.s32.totalorder %s1309_s4, %s873_s15  ;;  %p879_p2 = scmp.lt.u32.totalorder %s873_s15, %s1309_s4 }
 0x119   : > { %p875_p8 = pnand %p874_p12, %p699_p5 }
 0x11b   : > { %p876_p11 = pneg %p875_p8 }
 0x11d   : > { %p881_p13 = pnand %p879_p2, %p876_p11 }
 0x11f   : > { %884 = shalt.err (!%p881_p13)
}
 0x120   : > { %682 = dma.vmem_to_hbm [thread:$0]  (%p699_p5), %s552_s30, 64, %s1309_s4, [#allocation4]  }
 0x121   : > { %918 = dma.done.wait (%p699_p5), [#allocation4], 64  }
 0x122   : > { %920 = vsyncadd (%p699_p5), [#allocation4], 4294967232 }
 0x123 PF: > { %s19_s20 = sadd.s32 1, %s943_s20   ;;  %s1323_s15 = smov %s927_s16 }
 0x124   : > { %p16_p3 = scmp.ge.s32.totalorder %s19_s20, 6   ;;  %s1324_s16 = smov %s931_s17 }
 0x125   : > { %s1325_s17 = smov %s1021_s27  ;;  %s1326_s18 = smov %s939_s19 }
 0x126   : > { %s1327_s19 = smov %s1329_s21  ;;  %18 = sbr.rel (!%p16_p3) target bundleno = 6 (0x6), region = 95 }
 0x12d   :  { %564 = vsyncpa [#allocation3], 1 }
 0x12e   :  { %566 = vsyncpa [#allocation3 + $0x1], 1 }
 0x12f   :  { %567 = vsyncpa [#allocation6], 1 }
 0x130   :  { %569 = vsyncpa [#allocation6 + $0x1], 1 }
 0x131   :  { %570 = vsyncpa [#allocation4], 1 }
 0x132   :  { %572 = vsyncpa [#allocation4 + $0x1], 1 }

</bundles_post_ra>
